<compile_context>
chip_gen: v7x
topology: tpu7x:2x2x1
jax: 0.10.0
libtpu: 0.0.40
codegen_flags: <defaults>
</compile_context>

<pallas_src>
import functools

import jax
import jax.numpy as jnp
from jax.experimental import pallas as pl
from jax.experimental.pallas import tpu as pltpu

NUM_STATE = 4      # CartPole observation size
HL_SIZE = 64       # hl_size -> hidden width = hl_size * 2 = 128
HIDDEN = HL_SIZE * 2
N_ACTIONS = 2      # CartPole action space
OUT_PAD = 128      # lane-dense padded layer-2 weight width (MXU-friendly; padding hoisted to init)
NEG_SLOPE = 0.2


def _leaky_relu(x, slope=NEG_SLOPE):
    return jnp.where(x > 0, x, slope * x)


def _round_up(a, m):
    return (a + m - 1) // m * m


def dqn_kernel(x_ref, w1_ref, b1_ref, w2p_ref, b2p_ref, o_ref):
    x = x_ref[...]                                           # [TILE_B, NUM_STATE] f32

    # ---- Layer 1 on the VPU: K=4 contraction as 4 broadcast FMAs.
    #      Initialize h with bias + first FMA (no separate broadcast pass). ----
    h = b1_ref[...] + x[:, 0:1] * w1_ref[0:1, :]             # [TILE_B, HIDDEN]
    for k in range(1, NUM_STATE):                            # static unroll, 3 more FMAs
        h = h + x[:, k:k + 1] * w1_ref[k:k + 1, :]
    h = _leaky_relu(h)

    # ---- Layer 2 on the MXU (128x128 padded weights, f32 accumulate). ----
    y = jnp.dot(h, w2p_ref[...], preferred_element_type=jnp.float32) + b2p_ref[...]
    y = _leaky_relu(y)                                       # [TILE_B, OUT_PAD]

    # Store only the real action columns -> (TILE_B, N_ACTIONS) output in HBM.
    o_ref[...] = y[:, :N_ACTIONS].astype(o_ref.dtype)


def _choose_tile(B, tile_b):
    """Pick a batch tile (multiple of 8) and padded batch so the grid has >= 2 steps
    whenever the batch allows (engages both TensorCores on v7x)."""
    cap = max(8, _round_up(tile_b, 8))
    b8 = _round_up(max(B, 1), 8)
    if b8 <= 8:
        return 8, 8
    tb = min(cap, _round_up(pl.cdiv(b8, 2), 8))
    return tb, _round_up(b8, tb)


@functools.partial(jax.jit, static_argnames=("tile_b",))
def dqn_forward(x, w1, b1, w2p, b2p, *, tile_b=1024):
    """x: [B, NUM_STATE]; w1: [NUM_STATE, HIDDEN]; b1: [1, HIDDEN];
    w2p: [HIDDEN, OUT_PAD] (zero-padded beyond N_ACTIONS); b2p: [1, OUT_PAD]."""
    B = x.shape[0]
    tb, Bp = _choose_tile(B, tile_b)
    if Bp != B:
        x = jnp.pad(x, ((0, Bp - B), (0, 0)))

    param_bytes = 4 * (NUM_STATE * HIDDEN + HIDDEN + HIDDEN * OUT_PAD + OUT_PAD)
    cost = pl.CostEstimate(
        flops=2 * Bp * HIDDEN * (NUM_STATE + OUT_PAD),
        transcendentals=0,
        bytes_accessed=Bp * 4 * (NUM_STATE + N_ACTIONS) + param_bytes,
    )

    out = pl.pallas_call(
        dqn_kernel,
        out_shape=jax.ShapeDtypeStruct((Bp, N_ACTIONS), jnp.float32),
        grid=(Bp // tb,),
        in_specs=[
            pl.BlockSpec((tb, NUM_STATE), lambda i: (i, 0)),        # x: tiled over batch
            pl.BlockSpec((NUM_STATE, HIDDEN), lambda i: (0, 0)),    # w1: VMEM-resident
            pl.BlockSpec((1, HIDDEN), lambda i: (0, 0)),            # b1: VMEM-resident
            pl.BlockSpec((HIDDEN, OUT_PAD), lambda i: (0, 0)),      # w2 (padded): resident
            pl.BlockSpec((1, OUT_PAD), lambda i: (0, 0)),           # b2 (padded): resident
        ],
        out_specs=pl.BlockSpec((tb, N_ACTIONS), lambda i: (i, 0)),  # only real columns in HBM
        compiler_params=pltpu.CompilerParams(
            dimension_semantics=("parallel",),                      # megacore on v7x
        ),
        cost_estimate=cost,
    )(x, w1, b1, w2p, b2p)

    return out[:B] if Bp != B else out


def init_params(key):
    # Mimic PyTorch nn.Linear default init: U(-1/sqrt(fan_in), 1/sqrt(fan_in)),
    # deterministically from a JAX PRNG key (synthetic weights, no checkpoint).
    # Layer-2 params are stored pre-padded to OUT_PAD columns (canonical layout).
    k1, k2, k3, k4 = jax.random.split(key, 4)
    bound1 = 1.0 / jnp.sqrt(NUM_STATE)
    bound2 = 1.0 / jnp.sqrt(HIDDEN)
    w1 = jax.random.uniform(k1, (NUM_STATE, HIDDEN), jnp.float32, -bound1, bound1)
    b1 = jax.random.uniform(k2, (1, HIDDEN), jnp.float32, -bound1, bound1)
    w2 = jax.random.uniform(k3, (HIDDEN, N_ACTIONS), jnp.float32, -bound2, bound2)
    b2 = jax.random.uniform(k4, (1, N_ACTIONS), jnp.float32, -bound2, bound2)
    w2p = jnp.zeros((HIDDEN, OUT_PAD), jnp.float32).at[:, :N_ACTIONS].set(w2)
    b2p = jnp.zeros((1, OUT_PAD), jnp.float32).at[:, :N_ACTIONS].set(b2)
    return w1, b1, w2p, b2p


def reference_forward(x, w1, b1, w2p, b2p):
    h = jax.nn.leaky_relu(x @ w1 + b1, NEG_SLOPE)
    return jax.nn.leaky_relu(h @ w2p[:, :N_ACTIONS] + b2p[:, :N_ACTIONS], NEG_SLOPE)


if __name__ == "__main__":
    key = jax.random.PRNGKey(0)
    kx, kp, kx2 = jax.random.split(key, 3)
    w1, b1, w2p, b2p = init_params(kp)

    # Small per-step RL batch (single-tile path).
    B = 8
    x = jax.random.normal(kx, (B, NUM_STATE), jnp.float32)
    out = jax.block_until_ready(dqn_forward(x, w1, b1, w2p, b2p))
    ref = reference_forward(x, w1, b1, w2p, b2p)
    assert out.shape == (B, N_ACTIONS)
    assert jnp.allclose(out, ref, atol=1e-5, rtol=1e-5), "mismatch vs reference (B=8)"

    # Replay-buffer style batch exercising the multi-step grid + batch-padding path.
    B2 = 200
    x2 = jax.random.normal(kx2, (B2, NUM_STATE), jnp.float32)
    out2 = jax.block_until_ready(dqn_forward(x2, w1, b1, w2p, b2p, tile_b=64))
    ref2 = reference_forward(x2, w1, b1, w2p, b2p)
    assert out2.shape == (B2, N_ACTIONS)
    assert jnp.allclose(out2, ref2, atol=1e-5, rtol=1e-5), "mismatch vs reference (B=200)"

    print("KERNEL_OK")
</pallas_src>

<mosaic_0001>
module attributes {stable_mosaic.version = 11 : i64} {
  func.func @dqn_kernel(%arg0: i32, %arg1: memref<8x4xf32, #tpu.memory_space<vmem>>, %arg2: memref<4x128xf32, #tpu.memory_space<vmem>>, %arg3: memref<1x128xf32, #tpu.memory_space<vmem>>, %arg4: memref<128x128xf32, #tpu.memory_space<vmem>>, %arg5: memref<1x128xf32, #tpu.memory_space<vmem>>, %arg6: memref<8x2xf32, #tpu.memory_space<vmem>>) attributes {dimension_semantics = [#tpu.dimension_semantics<parallel>], iteration_bounds = array<i64: 1>, scalar_prefetch = 0 : i64, scratch_operands = 0 : i64, tpu.core_type = #tpu.core_type<tc>, window_params = [{transform_indices = @transform_0, window_bounds = array<i64: 8, 4>}, {pipeline_mode = #tpu.pipeline_mode<synchronous>, transform_indices = @transform_1, window_bounds = array<i64: 4, 128>}, {pipeline_mode = #tpu.pipeline_mode<synchronous>, transform_indices = @transform_2, window_bounds = array<i64: 1, 128>}, {pipeline_mode = #tpu.pipeline_mode<synchronous>, transform_indices = @transform_3, window_bounds = array<i64: 128, 128>}, {pipeline_mode = #tpu.pipeline_mode<synchronous>, transform_indices = @transform_4, window_bounds = array<i64: 1, 128>}, {transform_indices = @transform_5, window_bounds = array<i64: 8, 2>}]} {
    %c0 = arith.constant 0 : index
    %c0_0 = arith.constant 0 : index
    %0 = vector.load %arg1[%c0, %c0_0] : memref<8x4xf32, #tpu.memory_space<vmem>>, vector<8x4xf32>
    %c0_1 = arith.constant 0 : index
    %c0_2 = arith.constant 0 : index
    %1 = vector.load %arg3[%c0_1, %c0_2] : memref<1x128xf32, #tpu.memory_space<vmem>>, vector<1x128xf32>
    %2 = vector.extract_strided_slice %0 {offsets = [0, 0], sizes = [8, 1], strides = [1, 1]} : vector<8x4xf32> to vector<8x1xf32>
    %c0_3 = arith.constant 0 : index
    %c0_4 = arith.constant 0 : index
    %3 = vector.load %arg2[%c0_3, %c0_4] : memref<4x128xf32, #tpu.memory_space<vmem>>, vector<1x128xf32>
    %4 = vector.broadcast %2 : vector<8x1xf32> to vector<8x128xf32>
    %5 = vector.broadcast %3 : vector<1x128xf32> to vector<8x128xf32>
    %6 = arith.mulf %4, %5 : vector<8x128xf32>
    %7 = vector.broadcast %1 : vector<1x128xf32> to vector<8x128xf32>
    %8 = arith.addf %7, %6 : vector<8x128xf32>
    %9 = vector.extract_strided_slice %0 {offsets = [0, 1], sizes = [8, 1], strides = [1, 1]} : vector<8x4xf32> to vector<8x1xf32>
    %c1 = arith.constant 1 : index
    %c0_5 = arith.constant 0 : index
    %10 = vector.load %arg2[%c1, %c0_5] : memref<4x128xf32, #tpu.memory_space<vmem>>, vector<1x128xf32>
    %11 = vector.broadcast %9 : vector<8x1xf32> to vector<8x128xf32>
    %12 = vector.broadcast %10 : vector<1x128xf32> to vector<8x128xf32>
    %13 = arith.mulf %11, %12 : vector<8x128xf32>
    %14 = arith.addf %8, %13 : vector<8x128xf32>
    %15 = vector.extract_strided_slice %0 {offsets = [0, 2], sizes = [8, 1], strides = [1, 1]} : vector<8x4xf32> to vector<8x1xf32>
    %c2 = arith.constant 2 : index
    %c0_6 = arith.constant 0 : index
    %16 = vector.load %arg2[%c2, %c0_6] : memref<4x128xf32, #tpu.memory_space<vmem>>, vector<1x128xf32>
    %17 = vector.broadcast %15 : vector<8x1xf32> to vector<8x128xf32>
    %18 = vector.broadcast %16 : vector<1x128xf32> to vector<8x128xf32>
    %19 = arith.mulf %17, %18 : vector<8x128xf32>
    %20 = arith.addf %14, %19 : vector<8x128xf32>
    %21 = vector.extract_strided_slice %0 {offsets = [0, 3], sizes = [8, 1], strides = [1, 1]} : vector<8x4xf32> to vector<8x1xf32>
    %c3 = arith.constant 3 : index
    %c0_7 = arith.constant 0 : index
    %22 = vector.load %arg2[%c3, %c0_7] : memref<4x128xf32, #tpu.memory_space<vmem>>, vector<1x128xf32>
    %23 = vector.broadcast %21 : vector<8x1xf32> to vector<8x128xf32>
    %24 = vector.broadcast %22 : vector<1x128xf32> to vector<8x128xf32>
    %25 = arith.mulf %23, %24 : vector<8x128xf32>
    %26 = arith.addf %20, %25 : vector<8x128xf32>
    %cst = arith.constant 0.000000e+00 : f32
    %27 = vector.broadcast %cst : f32 to vector<8x128xf32>
    %28 = arith.cmpf ogt, %26, %27 : vector<8x128xf32>
    %cst_8 = arith.constant 2.000000e-01 : f32
    %29 = vector.broadcast %cst_8 : f32 to vector<8x128xf32>
    %30 = arith.mulf %29, %26 : vector<8x128xf32>
    %31 = arith.select %28, %26, %30 : vector<8x128xi1>, vector<8x128xf32>
    %c0_9 = arith.constant 0 : index
    %c0_10 = arith.constant 0 : index
    %32 = vector.load %arg4[%c0_9, %c0_10] : memref<128x128xf32, #tpu.memory_space<vmem>>, vector<128x128xf32>
    %cst_11 = arith.constant dense<0.000000e+00> : vector<8x128xf32>
    %33 = tpu.matmul %31, %32, %cst_11 {dimension_numbers = #tpu.dot_dimension_numbers<[1], [0], [0], [1], [0, 0, 1, 1], [], []>} : vector<8x128xf32>, vector<128x128xf32>, vector<8x128xf32> -> vector<8x128xf32>
    %c0_12 = arith.constant 0 : index
    %c0_13 = arith.constant 0 : index
    %34 = vector.load %arg5[%c0_12, %c0_13] : memref<1x128xf32, #tpu.memory_space<vmem>>, vector<1x128xf32>
    %35 = vector.broadcast %34 : vector<1x128xf32> to vector<8x128xf32>
    %36 = arith.addf %33, %35 : vector<8x128xf32>
    %cst_14 = arith.constant 0.000000e+00 : f32
    %37 = vector.broadcast %cst_14 : f32 to vector<8x128xf32>
    %38 = arith.cmpf ogt, %36, %37 : vector<8x128xf32>
    %cst_15 = arith.constant 2.000000e-01 : f32
    %39 = vector.broadcast %cst_15 : f32 to vector<8x128xf32>
    %40 = arith.mulf %39, %36 : vector<8x128xf32>
    %41 = arith.select %38, %36, %40 : vector<8x128xi1>, vector<8x128xf32>
    %42 = vector.extract_strided_slice %41 {offsets = [0, 0], sizes = [8, 2], strides = [1, 1]} : vector<8x128xf32> to vector<8x2xf32>
    %c0_16 = arith.constant 0 : index
    %c0_17 = arith.constant 0 : index
    %43 = vector.load %arg6[%c0_16, %c0_17] : memref<8x2xf32, #tpu.memory_space<vmem>>, vector<8x2xf32>
    tpu.vector_store %arg6[%c0_16, %c0_17], %42 {strides = array<i32>} : memref<8x2xf32, #tpu.memory_space<vmem>>, vector<8x2xf32>,
    return
  }
  func.func @transform_0(%arg0: i32) -> (i32, i32) {
    %c0_i32 = arith.constant 0 : i32
    %c0_i32_0 = arith.constant 0 : i32
    return %arg0, %c0_i32 : i32, i32
  }
  func.func @transform_1(%arg0: i32) -> (i32, i32) {
    %c0_i32 = arith.constant 0 : i32
    %c0_i32_0 = arith.constant 0 : i32
    %c0_i32_1 = arith.constant 0 : i32
    return %c0_i32, %c0_i32_0 : i32, i32
  }
  func.func @transform_2(%arg0: i32) -> (i32, i32) {
    %c0_i32 = arith.constant 0 : i32
    %c0_i32_0 = arith.constant 0 : i32
    %c0_i32_1 = arith.constant 0 : i32
    return %c0_i32, %c0_i32_0 : i32, i32
  }
  func.func @transform_3(%arg0: i32) -> (i32, i32) {
    %c0_i32 = arith.constant 0 : i32
    %c0_i32_0 = arith.constant 0 : i32
    %c0_i32_1 = arith.constant 0 : i32
    return %c0_i32, %c0_i32_0 : i32, i32
  }
  func.func @transform_4(%arg0: i32) -> (i32, i32) {
    %c0_i32 = arith.constant 0 : i32
    %c0_i32_0 = arith.constant 0 : i32
    %c0_i32_1 = arith.constant 0 : i32
    return %c0_i32, %c0_i32_0 : i32, i32
  }
  func.func @transform_5(%arg0: i32) -> (i32, i32) {
    %c0_i32 = arith.constant 0 : i32
    %c0_i32_0 = arith.constant 0 : i32
    return %arg0, %c0_i32 : i32, i32
  }
}

</mosaic_0001>

<bundles_post_ra>
// kernel: dqn_forward.1
= control target key start
LH: loop header
LB: loop body
LE: loop exit
PB: predicated region body
PF: predicated region fallthrough
CT: control target
= control target key end

     0   :  { %10 = vsyncpa [#allocation3], 0  ;;  %s314_s18 = smov [#allocation2]   ;;  %s390_s0 = inlined_call_operand.vmem [shape: f32[8,4], index: 0, kind: input, shape index: {}]   ;;  %s391_s1 = inlined_call_operand.vmem [shape: f32[4,128], index: 1, kind: input, shape index: {}]   ;;  %s392_s2 = inlined_call_operand.vmem [shape: f32[1,128], index: 2, kind: input, shape index: {}]   ;;  %s393_s3 = inlined_call_operand.hbm [shape: f32[128,128], index: 3, kind: input, shape index: {}]   ;;  %s394_s4 = inlined_call_operand.vmem [shape: f32[1,128], index: 4, kind: input, shape index: {}]   ;;  %s395_s5 = inlined_call_operand.vmem [shape: f32[8,2], index: 5, kind: output, shape index: {}]  }
   0x1   :  { %s22_s19 = sshll.u32 %s314_s18, 4  ;;  %s290_s22 = scalar_lea.hbm %s393_s3, 2048  ;;  %s23_s19 = int_to_ptr.vmem [resolvable:$true] %s22_s19 }
   0x2   :  { %p291_p0 = scmp.ne.s32.totalorder %s393_s3, %s290_s22  ;;  %p294_p1 = scmp.lt.u32.totalorder %s290_s22, %s393_s3 }
   0x4   :  { %p296_p2 = pnand %p294_p1, %p291_p0 }
   0x6   :  { %299 = shalt.err (!%p296_p2)
}
   0x7   :  { %s300_s27 = scalar_lea.vmem %s23_s19, 2048  ;;  %p305_p4 = scmp.lt.s32.totalorder %s23_s19, %s23_s19 }
   0x8   :  { %p301_p3 = scmp.ne.s32.totalorder %s23_s19, %s300_s27  ;;  %p306_p5 = scmp.lt.s32.totalorder %s300_s27, %s300_s27 }
   0xa   :  { %p307_p6 = por %p306_p5, %p305_p4 }
   0xc   :  { %p308_p7 = pnand %p307_p6, %p301_p3 }
   0xe   :  { %311 = shalt.err (!%p308_p7)
}
   0xf   :  { %s315_s28 = smov 128   ;;  %s316_s29 = smov 8  }
  0x10   :  { %28 = dma.hbm_to_vmem [thread:$0]  %s393_s3, 2048, %s23_s19, [#allocation3], %s315_s28, %s315_s28, %s316_s29  }
  0x11   :  { %312 = dma.done.wait [#allocation3], 2048  }
  0x12   :  { %313 = vsyncadd [#allocation3], 4294965248  ;;  %v317_v0 = vmov 0   ;;  %v318_v1 = vmov 2   ;;  %v319_v2 = vmov 0.0|0.0   ;;  %v34_v3 = vld [vmem:[%s390_s0] sm:$0xff] }
  0x13   :  { %285 = vset.pattern.permute.xlu0 %v317_v0  ;;  %287 = vset.pattern.permute.xlu1 %v318_v1  ;;  %v90_v4 = vld [vmem:[#allocation2] sm:$0xff]  ;;  %v91_v5 = vld [vmem:[#allocation2 + $0x8] sm:$0xff]  ;;  %v92_v7 = vld [vmem:[#allocation2 + $0x10] sm:$0xff]  ;;  %v320_v12 = vmov 1   ;;  %v321_v13 = vmov 3   ;;  %vm322_vm0 = vmmov 0  }
  0x14   :  { %251 = vmatprep.subr.bf16.mxu0 %v319_v2  ;;  %39 = vperm.xlu0 %285, %v34_v3   ;;  %v252_v6 = vpack.c.bf16 %v91_v5, %v90_v4  ;;  %v93_v8 = vld [vmem:[#allocation2 + $0x18] sm:$0xff]  ;;  %v94_v10 = vld [vmem:[#allocation2 + $0x20] sm:$0xff]  ;;  %v95_v11 = vld [vmem:[#allocation2 + $0x28] sm:$0xff]  ;;  %v323_v20 = vmov 0.0   ;;  %vm186_vm3 = vcmask 15360  }
  0x15   :  { %67 = vperm.xlu1 %287, %v34_v3   ;;  %v255_v9 = vpack.c.bf16 %v93_v8, %v92_v7  ;;  %v258_v14 = vpack.c.bf16 %v95_v11, %v94_v10  ;;  %v96_v15 = vld [vmem:[#allocation2 + $0x30] sm:$0xff]  ;;  %v97_v16 = vld [vmem:[#allocation2 + $0x38] sm:$0xff]  ;;  %v98_v18 = vld [vmem:[#allocation2 + $0x40] sm:$0xff]  ;;  %248 = vmatprep.mubr.msk.f32.mxu0 %vm322_vm0, %v323_v20 }
  0x16   :  { %253 = vmatpush3.bf16.msra.mxu0 %v252_v6  ;;  %v261_v17 = vpack.c.bf16 %v97_v16, %v96_v15  ;;  %v99_v19 = vld [vmem:[#allocation2 + $0x48] sm:$0xff]  ;;  %v100_v22 = vld [vmem:[#allocation2 + $0x50] sm:$0xff]  ;;  %v101_v23 = vld [vmem:[#allocation2 + $0x58] sm:$0xff] }
  0x17   :  { %254 = vmatprep.subr.bf16.mxu0 %v319_v2  ;;  %v264_v21 = vpack.c.bf16 %v99_v19, %v98_v18  ;;  %v267_v24 = vpack.c.bf16 %v101_v23, %v100_v22  ;;  %v102_v25 = vld [vmem:[#allocation2 + $0x60] sm:$0xff]  ;;  %v103_v26 = vld [vmem:[#allocation2 + $0x68] sm:$0xff]  ;;  %v104_v28 = vld [vmem:[#allocation2 + $0x70] sm:$0xff] }
  0x18   :  { %286 = vset.pattern.permute.xlu0 %v320_v12  ;;  %v270_v27 = vpack.c.bf16 %v103_v26, %v102_v25  ;;  %v105_v29 = vld [vmem:[#allocation2 + $0x78] sm:$0xff]  ;;  %v193_v31 = vld [vmem:[%s391_s1] ss:$0 sm:$0xff]  ;;  %v195_v36 = vld [vmem:[%s391_s1 + $0x1] ss:$0 sm:$0xff] }
  0x19   :  { %288 = vset.pattern.permute.xlu1 %v321_v13  ;;  %56 = vperm.xlu0 %286, %v34_v3   ;;  %v273_v30 = vpack.c.bf16 %v105_v29, %v104_v28  ;;  %v194_v35 = vld [vmem:[%s392_s2] ss:$0 sm:$0xff]  ;;  %v196_v37 = vld [vmem:[%s391_s1 + $0x2] ss:$0 sm:$0xff]  ;;  %v197_v39 = vld [vmem:[%s391_s1 + $0x3] ss:$0 sm:$0xff] }
  0x1a   :  { %78 = vperm.xlu1 %288, %v34_v3   ;;  %256 = vmatpush3.bf16.msra.mxu0 %v255_v9  ;;  %v198_v50 = vld [vmem:[%s394_s4] ss:$0 sm:$0xff] }
  0x1b   :  { %257 = vmatprep.subr.bf16.mxu0 %v319_v2 }
  0x1d   :  { %289 = vset.pattern.permute.xlu0 %v321_v13 }
  0x1e   :  { %259 = vmatpush3.bf16.msra.mxu0 %v258_v14 }
  0x1f   :  { %260 = vmatprep.subr.bf16.mxu0 %v319_v2 }
  0x22   :  { %262 = vmatpush3.bf16.msra.mxu0 %v261_v17 }
  0x23   :  { %263 = vmatprep.subr.bf16.mxu0 %v319_v2 }
  0x26   :  { %265 = vmatpush3.bf16.msra.mxu0 %v264_v21 }
  0x27   :  { %266 = vmatprep.subr.bf16.mxu0 %v319_v2 }
  0x2a   :  { %268 = vmatpush3.bf16.msra.mxu0 %v267_v24 }
  0x2b   :  { %269 = vmatprep.subr.bf16.mxu0 %v319_v2 }
  0x2e   :  { %271 = vmatpush3.bf16.msra.mxu0 %v270_v27 }
  0x2f   :  { %272 = vmatprep.subr.bf16.mxu0 %v319_v2 }
  0x32   :  { %274 = vmatpush3.bf16.msra.mxu0 %v273_v30 }
  0x93   :  { %v40_v32 = vpop.permute.xlu0 %39 }
  0x94   :  { %v68_v33 = vpop.permute.xlu1 %67  ;;  %v46_v34 = vmul.f32 %v193_v31, %v40_v32 }
  0x95   :  { %v74_v43 = vmul.f32 %v196_v37, %v68_v33 }
  0x96   :  { %v53_v41 = vadd.f32 %v194_v35, %v46_v34 }
  0x98   :  { %v57_v38 = vpop.permute.xlu0 %56 }
  0x99   :  { %v79_v40 = vpop.permute.xlu1 %78  ;;  %v63_v42 = vmul.f32 %v195_v36, %v57_v38 }
  0x9a   :  { %v85_v45 = vmul.f32 %v197_v39, %v79_v40 }
  0x9b   :  { %v64_v44 = vadd.f32 %v63_v42, %v53_v41 }
  0x9d   :  { %v75_v46 = vadd.f32 %v74_v43, %v64_v44 }
  0x9f   :  { %v86_v47 = vadd.f32 %v85_v45, %v75_v46 }
  0xa1   :  { %vm87_vm1 = vcmp.gt.f32.partialorder %v86_v47, 0.0  ;;  %v88_v48 = vmul.f32 0.2, %v86_v47 }
  0xa3   :  { %v89_v49 = vsel %vm87_vm1, %v86_v47, %v88_v48 }
  0xa4   :  { %249 = vmatmul.mubr.f32.vlgmr.msra.gmra.mrb[0].mxu0 %v89_v49 }
 0x177   :  { %v179_v51 = vpop.f32.mrb[0].mxu0 }
 0x178   :  { %v180_v52 = vadd.f32 %v198_v50, %v179_v51  ;;  %v250_v53 = vpop.f32.mrb[1].mxu0 }
 0x17a   :  { %vm183_vm2 = vcmp.gt.f32.partialorder %v180_v52, 0.0  ;;  %v184_v54 = vmul.f32 0.2, %v180_v52 }
 0x17c   :  { %v185_v55 = vsel %vm183_vm2, %v180_v52, %v184_v54 }
 0x17d   :  { %187 = vst.msk [vmem:[%s395_s5] sm:$0xff] %vm186_vm3, %v185_v55 }
 0x17e   :  { %192 = vsyncpa [#allocation3], 1 }

</bundles_post_ra>
